<compile_context>
chip_gen: v7x
topology: tpu7x:2x2x1
jax: 0.10.0
libtpu: 0.0.40
codegen_flags: <defaults>
</compile_context>

<pallas_src>
import functools

import jax
import jax.numpy as jnp
from jax import lax
from jax.experimental import pallas as pl
from jax.experimental.pallas import tpu as pltpu


def _round_up(a, b):
    return (a + b - 1) // b * b


# ---------------------------------------------------------------------------
# Kernel 1: QKV projection -> head-major bf16 Q/K/V.
# grid = (B, N_pad // TQ).  One C-deep, 3C-wide (lane-dense) matmul per tile,
# then static per-head extracts written to (B, H, N_pad, d) outputs.
# ---------------------------------------------------------------------------
def _qkv_proj_kernel(x_ref, wqkv_ref, bqkv_ref, q_ref, k_ref, v_ref, *,
                     num_heads, head_dim, has_qkv_bias):
    xt = x_ref[0]                                                  # (TQ, C) bf16
    qkv = jnp.dot(xt, wqkv_ref[...],
                  preferred_element_type=jnp.float32)              # (TQ, 3C) f32
    if has_qkv_bias:
        qkv = qkv + bqkv_ref[...]                                  # (1, 3C) f32
    qkv = qkv.astype(jnp.bfloat16)
    d = head_dim
    C = num_heads * head_dim
    for h in range(num_heads):                                     # static offsets
        q_ref[0, h] = qkv[:, h * d:(h + 1) * d]                    # Q (scale folded)
        k_ref[0, h] = qkv[:, C + h * d:C + (h + 1) * d]            # K
        v_ref[0, h] = qkv[:, 2 * C + h * d:2 * C + (h + 1) * d]    # V


# ---------------------------------------------------------------------------
# Kernel 2: per-query-tile attention + single C-deep output projection.
# grid = (B, N_pad // TQ), both axes parallel.  Q block (1,H,TQ,d); K/V blocks
# (1,H,N_pad,d) stay resident across the query tiles of a batch element.
# ---------------------------------------------------------------------------
def _attn_kernel(q_ref, k_ref, v_ref, wproj_ref, bproj_ref, o_ref, hbuf, *,
                 num_heads, head_dim, n_valid):
    n_pad = k_ref.shape[2]
    d = head_dim
    for h in range(num_heads):                                     # static loop
        qh = q_ref[0, h]                                           # (TQ, d)   bf16, pre-scaled
        kh = k_ref[0, h]                                           # (Npad, d) bf16
        vh = v_ref[0, h]                                           # (Npad, d) bf16

        # scores = q . k  (contract head dim directly; no transpose)
        s = lax.dot_general(qh, kh, (((1,), (1,)), ((), ())),
                            preferred_element_type=jnp.float32)    # (TQ, Npad) f32
        if n_valid < n_pad:                                        # static branch
            key_ok = lax.broadcasted_iota(jnp.int32, s.shape, 1) < n_valid
            s = jnp.where(key_ok, s, -1e30)

        # numerically-safe softmax over keys (f32 math, EUP reciprocal)
        s = s - jnp.max(s, axis=-1, keepdims=True)
        p = jnp.exp(s)
        p = p * pl.reciprocal(jnp.sum(p, axis=-1, keepdims=True), approx=True)

        ho = jnp.dot(p.astype(jnp.bfloat16), vh,
                     preferred_element_type=jnp.float32)           # (TQ, d) f32

        # head output -> bf16 scratch at its (static) channel offset
        hbuf[:, h * d:(h + 1) * d] = ho.astype(jnp.bfloat16)

    # single C-deep output projection
    out = jnp.dot(hbuf[...], wproj_ref[...],
                  preferred_element_type=jnp.float32) + bproj_ref[...]
    o_ref[0] = out.astype(o_ref.dtype)


# ---------------------------------------------------------------------------
# Parameter prep (one-time): select task, transpose to (in, out), fold the
# 1/sqrt(d) attention scale into the Q columns, cast weights to bf16.
# ---------------------------------------------------------------------------
def prepare_task_params(params, task_idx, num_heads):
    w_qkv = params["w_qkv"][task_idx]            # (3C, C)  PyTorch (out, in)
    b_qkv = params["b_qkv"][task_idx]            # (3C,)
    w_proj = params["w_proj"][task_idx]          # (C, C)
    b_proj = params["b_proj"][task_idx]          # (C,)

    C = w_proj.shape[0]
    d = C // num_heads
    scale = d ** -0.5
    col_scale = jnp.concatenate(
        [jnp.full((C,), scale, jnp.float32), jnp.ones((2 * C,), jnp.float32)])

    return {
        "w_qkv_t": (w_qkv.T * col_scale[None, :]).astype(jnp.bfloat16),  # (C, 3C)
        "b_qkv": (b_qkv * col_scale).astype(jnp.float32)[None, :],       # (1, 3C)
        "w_proj_t": w_proj.T.astype(jnp.bfloat16),                       # (C, C)
        "b_proj": b_proj.astype(jnp.float32)[None, :],                   # (1, C)
    }


def task_specific_attention(x, prepared, num_heads, *, has_qkv_bias=True):
    """Apply the (already prepared) task-specific attention block to x (B,N,C)."""
    B, N, C = x.shape
    assert C % num_heads == 0, "C must be divisible by num_heads"
    H = num_heads
    d = C // H
    elt_out = jnp.dtype(x.dtype).itemsize

    # Per-core VMEM capacity (v5e/v6e 128 MiB, v7x 64 MiB); conservative fallback.
    try:
        phys_vmem = int(pltpu.get_tpu_info().vmem_capacity_bytes)
    except Exception:
        phys_vmem = 64 << 20
    vmem_cap = int(phys_vmem * 0.85)

    # Query tile: large tiles amortize per-step overhead (v5e/v6e), while the
    # dominant VMEM term (resident K/V) is TQ-independent.
    if N <= 256:
        TQ = _round_up(N, 8)
    elif phys_vmem >= (96 << 20) and N >= 1024:
        TQ = 512
    else:
        TQ = 256
    N_pad = _round_up(N, TQ)
    NQ = N_pad // TQ

    # Pad the sequence once (keys masked in-kernel, pad query rows sliced off)
    # and cast to bf16 once, outside the kernels.
    x_bf = x.astype(jnp.bfloat16)
    if N_pad != N:
        x_bf = jnp.pad(x_bf, ((0, 0), (0, N_pad - N), (0, 0)))

    # ---- Kernel 1: QKV projection into head-major (B, H, N_pad, d) bf16 ----
    qkv_kernel = functools.partial(_qkv_proj_kernel, num_heads=H, head_dim=d,
                                   has_qkv_bias=has_qkv_bias)
    est1 = (2 * TQ * C * 2                      # x tile, double-buffered
            + 3 * C * C * 2 + 3 * C * 4         # resident weights + bias
            + 2 * 3 * TQ * C * 2                # q/k/v out tiles, double-buffered
            + 4 * TQ * 3 * C * 4)               # f32 intermediates / margin
    vmem1 = min(max(2 * est1, 8 << 20), vmem_cap)

    q_arr, k_arr, v_arr = pl.pallas_call(
        qkv_kernel,
        out_shape=(jax.ShapeDtypeStruct((B, H, N_pad, d), jnp.bfloat16),
                   jax.ShapeDtypeStruct((B, H, N_pad, d), jnp.bfloat16),
                   jax.ShapeDtypeStruct((B, H, N_pad, d), jnp.bfloat16)),
        grid_spec=pltpu.PrefetchScalarGridSpec(
            num_scalar_prefetch=0,
            grid=(B, NQ),
            in_specs=[
                pl.BlockSpec((1, TQ, C), lambda b, q: (b, q, 0)),      # x (bf16)
                pl.BlockSpec((C, 3 * C), lambda b, q: (0, 0)),         # W_qkv^T (scaled, bf16)
                pl.BlockSpec((1, 3 * C), lambda b, q: (0, 0)),         # b_qkv (scaled, f32)
            ],
            out_specs=[
                pl.BlockSpec((1, H, TQ, d), lambda b, q: (b, 0, q, 0)),  # Q
                pl.BlockSpec((1, H, TQ, d), lambda b, q: (b, 0, q, 0)),  # K
                pl.BlockSpec((1, H, TQ, d), lambda b, q: (b, 0, q, 0)),  # V
            ],
        ),
        compiler_params=pltpu.CompilerParams(
            dimension_semantics=("parallel", "parallel"),
            vmem_limit_bytes=vmem1),
    )(x_bf, prepared["w_qkv_t"], prepared["b_qkv"])

    # ---- Kernel 2: attention + output projection ---------------------------
    attn_kernel = functools.partial(_attn_kernel, num_heads=H, head_dim=d,
                                    n_valid=N)
    est2 = (2 * TQ * C * 2                      # Q tile, double-buffered
            + 2 * 2 * N_pad * C * 2             # K + V blocks, double-buffered
            + C * C * 2 + C * 4                 # proj weight + bias (resident)
            + 2 * TQ * C * elt_out              # output tile, double-buffered
            + TQ * C * 2                        # head-output scratch (bf16)
            + 4 * TQ * N_pad * 4                # score / prob intermediates
            + 2 * TQ * C * 4)                   # projection f32 intermediates
    vmem2 = min(max(2 * est2, 8 << 20), vmem_cap)

    out = pl.pallas_call(
        attn_kernel,
        out_shape=jax.ShapeDtypeStruct((B, N_pad, C), x.dtype),
        grid_spec=pltpu.PrefetchScalarGridSpec(
            num_scalar_prefetch=0,
            grid=(B, NQ),
            in_specs=[
                pl.BlockSpec((1, H, TQ, d), lambda b, q: (b, 0, q, 0)),     # Q heads
                pl.BlockSpec((1, H, N_pad, d), lambda b, q: (b, 0, 0, 0)),  # K heads (whole seq)
                pl.BlockSpec((1, H, N_pad, d), lambda b, q: (b, 0, 0, 0)),  # V heads (whole seq)
                pl.BlockSpec((C, C), lambda b, q: (0, 0)),                  # W_proj^T (bf16)
                pl.BlockSpec((1, C), lambda b, q: (0, 0)),                  # b_proj (f32)
            ],
            out_specs=pl.BlockSpec((1, TQ, C), lambda b, q: (b, q, 0)),
            scratch_shapes=[pltpu.VMEM((TQ, C), jnp.bfloat16)],             # head concat buffer
        ),
        compiler_params=pltpu.CompilerParams(
            dimension_semantics=("parallel", "parallel"),
            vmem_limit_bytes=vmem2),
    )(q_arr, k_arr, v_arr, prepared["w_proj_t"], prepared["b_proj"])

    if N_pad != N:
        out = out[:, :N, :]
    return out


def init_params(key, dim, num_tasks, qkv_bias=False):
    """Deterministic synthetic parameters, PyTorch Linear layout (out, in)."""
    k1, k2, k3, k4 = jax.random.split(key, 4)
    w_qkv = 0.02 * jax.random.normal(k1, (num_tasks, 3 * dim, dim), jnp.float32)
    b_qkv = (0.02 * jax.random.normal(k2, (num_tasks, 3 * dim), jnp.float32)
             if qkv_bias else jnp.zeros((num_tasks, 3 * dim), jnp.float32))
    w_proj = 0.02 * jax.random.normal(k3, (num_tasks, dim, dim), jnp.float32)
    b_proj = 0.02 * jax.random.normal(k4, (num_tasks, dim), jnp.float32)
    return {"w_qkv": w_qkv, "b_qkv": b_qkv, "w_proj": w_proj, "b_proj": b_proj}


def reference_attention(x, params, task_idx, num_heads):
    """Pure-JAX f32 reference mirroring the PyTorch forward, for verification."""
    B, N, C = x.shape
    d = C // num_heads
    scale = d ** -0.5
    w_qkv = params["w_qkv"][task_idx]            # (3C, C)
    b_qkv = params["b_qkv"][task_idx]            # (3C,)
    w_proj = params["w_proj"][task_idx]          # (C, C)
    b_proj = params["b_proj"][task_idx]          # (C,)

    qkv = jnp.einsum("bnc,oc->bno", x, w_qkv) + b_qkv            # (B, N, 3C)
    qkv = qkv.reshape(B, N, 3, num_heads, d).transpose(2, 0, 3, 1, 4)
    q, k, v = qkv[0], qkv[1], qkv[2]                             # (B, H, N, d)
    attn = jnp.einsum("bhnd,bhmd->bhnm", q, k) * scale
    attn = jax.nn.softmax(attn, axis=-1)
    out = jnp.einsum("bhnm,bhmd->bhnd", attn, v)                 # (B, H, N, d)
    out = out.transpose(0, 2, 1, 3).reshape(B, N, C)
    return jnp.einsum("bnc,oc->bno", out, w_proj) + b_proj


if __name__ == "__main__":
    # Small shapes consistent with (B, N, C) attention.
    B, N, C = 2, 8, 32
    num_tasks = 3
    num_heads = 4
    task_idx = 1
    qkv_bias = False

    key = jax.random.PRNGKey(0)
    kx, kp = jax.random.split(key)
    x = jax.random.normal(kx, (B, N, C), jnp.float32)
    params = init_params(kp, C, num_tasks, qkv_bias=qkv_bias)

    prepared = prepare_task_params(params, task_idx, num_heads)
    out = task_specific_attention(x, prepared, num_heads, has_qkv_bias=qkv_bias)
    out = jax.block_until_ready(out)

    ref = reference_attention(x, params, task_idx, num_heads)
    assert out.shape == (B, N, C)
    # bf16 MXU operands + approx reciprocal => slightly looser tolerance vs f32 ref.
    assert jnp.allclose(out, ref, rtol=2e-2, atol=2e-3), "mismatch vs reference"

    print("KERNEL_OK")
</pallas_src>

<mosaic_0001>
module attributes {stable_mosaic.version = 11 : i64} {
  func.func @_qkv_proj_kernel(%arg0: i32, %arg1: i32, %arg2: memref<1x8x32xbf16, #tpu.memory_space<vmem>>, %arg3: memref<32x96xbf16, #tpu.memory_space<vmem>>, %arg4: memref<1x96xf32, #tpu.memory_space<vmem>>, %arg5: memref<1x4x8x8xbf16, #tpu.memory_space<vmem>>, %arg6: memref<1x4x8x8xbf16, #tpu.memory_space<vmem>>, %arg7: memref<1x4x8x8xbf16, #tpu.memory_space<vmem>>) attributes {dimension_semantics = [#tpu.dimension_semantics<parallel>, #tpu.dimension_semantics<parallel>], iteration_bounds = array<i64: 2, 1>, scalar_prefetch = 0 : i64, scratch_operands = 0 : i64, tpu.core_type = #tpu.core_type<tc>, window_params = [{transform_indices = @transform_0, window_bounds = array<i64: 1, 8, 32>}, {pipeline_mode = #tpu.pipeline_mode<synchronous>, transform_indices = @transform_1, window_bounds = array<i64: 32, 96>}, {pipeline_mode = #tpu.pipeline_mode<synchronous>, transform_indices = @transform_2, window_bounds = array<i64: 1, 96>}, {transform_indices = @transform_3, window_bounds = array<i64: 1, 4, 8, 8>}, {transform_indices = @transform_4, window_bounds = array<i64: 1, 4, 8, 8>}, {transform_indices = @transform_5, window_bounds = array<i64: 1, 4, 8, 8>}]} {
    %c0 = arith.constant 0 : index
    %c0_0 = arith.constant 0 : index
    %c0_1 = arith.constant 0 : index
    %0 = vector.load %arg2[%c0, %c0_0, %c0_1] : memref<1x8x32xbf16, #tpu.memory_space<vmem>>, vector<1x8x32xbf16>
    %1 = vector.shape_cast %0 : vector<1x8x32xbf16> to vector<8x32xbf16>
    %c0_2 = arith.constant 0 : index
    %c0_3 = arith.constant 0 : index
    %2 = vector.load %arg3[%c0_2, %c0_3] : memref<32x96xbf16, #tpu.memory_space<vmem>>, vector<32x96xbf16>
    %cst = arith.constant dense<0.000000e+00> : vector<8x96xf32>
    %3 = tpu.matmul %1, %2, %cst {dimension_numbers = #tpu.dot_dimension_numbers<[1], [0], [0], [1], [0, 0, 1, 1], [], []>} : vector<8x32xbf16>, vector<32x96xbf16>, vector<8x96xf32> -> vector<8x96xf32>
    %4 = arith.truncf %3 : vector<8x96xf32> to vector<8x96xbf16>
    %5 = vector.extract_strided_slice %4 {offsets = [0, 0], sizes = [8, 8], strides = [1, 1]} : vector<8x96xbf16> to vector<8x8xbf16>
    %c0_4 = arith.constant 0 : index
    %c0_5 = arith.constant 0 : index
    %c0_6 = arith.constant 0 : index
    %c0_7 = arith.constant 0 : index
    %6 = vector.load %arg5[%c0_4, %c0_5, %c0_6, %c0_7] : memref<1x4x8x8xbf16, #tpu.memory_space<vmem>>, vector<1x1x8x8xbf16>
    %7 = vector.shape_cast %6 : vector<1x1x8x8xbf16> to vector<8x8xbf16>
    %8 = vector.shape_cast %5 : vector<8x8xbf16> to vector<1x1x8x8xbf16>
    tpu.vector_store %arg5[%c0_4, %c0_5, %c0_6, %c0_7], %8 {strides = array<i32>} : memref<1x4x8x8xbf16, #tpu.memory_space<vmem>>, vector<1x1x8x8xbf16>,
    %9 = vector.extract_strided_slice %4 {offsets = [0, 32], sizes = [8, 8], strides = [1, 1]} : vector<8x96xbf16> to vector<8x8xbf16>
    %c0_8 = arith.constant 0 : index
    %c0_9 = arith.constant 0 : index
    %c0_10 = arith.constant 0 : index
    %c0_11 = arith.constant 0 : index
    %10 = vector.load %arg6[%c0_8, %c0_9, %c0_10, %c0_11] : memref<1x4x8x8xbf16, #tpu.memory_space<vmem>>, vector<1x1x8x8xbf16>
    %11 = vector.shape_cast %10 : vector<1x1x8x8xbf16> to vector<8x8xbf16>
    %12 = vector.shape_cast %9 : vector<8x8xbf16> to vector<1x1x8x8xbf16>
    tpu.vector_store %arg6[%c0_8, %c0_9, %c0_10, %c0_11], %12 {strides = array<i32>} : memref<1x4x8x8xbf16, #tpu.memory_space<vmem>>, vector<1x1x8x8xbf16>,
    %13 = vector.extract_strided_slice %4 {offsets = [0, 64], sizes = [8, 8], strides = [1, 1]} : vector<8x96xbf16> to vector<8x8xbf16>
    %c0_12 = arith.constant 0 : index
    %c0_13 = arith.constant 0 : index
    %c0_14 = arith.constant 0 : index
    %c0_15 = arith.constant 0 : index
    %14 = vector.load %arg7[%c0_12, %c0_13, %c0_14, %c0_15] : memref<1x4x8x8xbf16, #tpu.memory_space<vmem>>, vector<1x1x8x8xbf16>
    %15 = vector.shape_cast %14 : vector<1x1x8x8xbf16> to vector<8x8xbf16>
    %16 = vector.shape_cast %13 : vector<8x8xbf16> to vector<1x1x8x8xbf16>
    tpu.vector_store %arg7[%c0_12, %c0_13, %c0_14, %c0_15], %16 {strides = array<i32>} : memref<1x4x8x8xbf16, #tpu.memory_space<vmem>>, vector<1x1x8x8xbf16>,
    %17 = vector.extract_strided_slice %4 {offsets = [0, 8], sizes = [8, 8], strides = [1, 1]} : vector<8x96xbf16> to vector<8x8xbf16>
    %c0_16 = arith.constant 0 : index
    %c1 = arith.constant 1 : index
    %c0_17 = arith.constant 0 : index
    %c0_18 = arith.constant 0 : index
    %18 = vector.load %arg5[%c0_16, %c1, %c0_17, %c0_18] : memref<1x4x8x8xbf16, #tpu.memory_space<vmem>>, vector<1x1x8x8xbf16>
    %19 = vector.shape_cast %18 : vector<1x1x8x8xbf16> to vector<8x8xbf16>
    %20 = vector.shape_cast %17 : vector<8x8xbf16> to vector<1x1x8x8xbf16>
    tpu.vector_store %arg5[%c0_16, %c1, %c0_17, %c0_18], %20 {strides = array<i32>} : memref<1x4x8x8xbf16, #tpu.memory_space<vmem>>, vector<1x1x8x8xbf16>,
    %21 = vector.extract_strided_slice %4 {offsets = [0, 40], sizes = [8, 8], strides = [1, 1]} : vector<8x96xbf16> to vector<8x8xbf16>
    %c0_19 = arith.constant 0 : index
    %c1_20 = arith.constant 1 : index
    %c0_21 = arith.constant 0 : index
    %c0_22 = arith.constant 0 : index
    %22 = vector.load %arg6[%c0_19, %c1_20, %c0_21, %c0_22] : memref<1x4x8x8xbf16, #tpu.memory_space<vmem>>, vector<1x1x8x8xbf16>
    %23 = vector.shape_cast %22 : vector<1x1x8x8xbf16> to vector<8x8xbf16>
    %24 = vector.shape_cast %21 : vector<8x8xbf16> to vector<1x1x8x8xbf16>
    tpu.vector_store %arg6[%c0_19, %c1_20, %c0_21, %c0_22], %24 {strides = array<i32>} : memref<1x4x8x8xbf16, #tpu.memory_space<vmem>>, vector<1x1x8x8xbf16>,
    %25 = vector.extract_strided_slice %4 {offsets = [0, 72], sizes = [8, 8], strides = [1, 1]} : vector<8x96xbf16> to vector<8x8xbf16>
    %c0_23 = arith.constant 0 : index
    %c1_24 = arith.constant 1 : index
    %c0_25 = arith.constant 0 : index
    %c0_26 = arith.constant 0 : index
    %26 = vector.load %arg7[%c0_23, %c1_24, %c0_25, %c0_26] : memref<1x4x8x8xbf16, #tpu.memory_space<vmem>>, vector<1x1x8x8xbf16>
    %27 = vector.shape_cast %26 : vector<1x1x8x8xbf16> to vector<8x8xbf16>
    %28 = vector.shape_cast %25 : vector<8x8xbf16> to vector<1x1x8x8xbf16>
    tpu.vector_store %arg7[%c0_23, %c1_24, %c0_25, %c0_26], %28 {strides = array<i32>} : memref<1x4x8x8xbf16, #tpu.memory_space<vmem>>, vector<1x1x8x8xbf16>,
    %29 = vector.extract_strided_slice %4 {offsets = [0, 16], sizes = [8, 8], strides = [1, 1]} : vector<8x96xbf16> to vector<8x8xbf16>
    %c0_27 = arith.constant 0 : index
    %c2 = arith.constant 2 : index
    %c0_28 = arith.constant 0 : index
    %c0_29 = arith.constant 0 : index
    %30 = vector.load %arg5[%c0_27, %c2, %c0_28, %c0_29] : memref<1x4x8x8xbf16, #tpu.memory_space<vmem>>, vector<1x1x8x8xbf16>
    %31 = vector.shape_cast %30 : vector<1x1x8x8xbf16> to vector<8x8xbf16>
    %32 = vector.shape_cast %29 : vector<8x8xbf16> to vector<1x1x8x8xbf16>
    tpu.vector_store %arg5[%c0_27, %c2, %c0_28, %c0_29], %32 {strides = array<i32>} : memref<1x4x8x8xbf16, #tpu.memory_space<vmem>>, vector<1x1x8x8xbf16>,
    %33 = vector.extract_strided_slice %4 {offsets = [0, 48], sizes = [8, 8], strides = [1, 1]} : vector<8x96xbf16> to vector<8x8xbf16>
    %c0_30 = arith.constant 0 : index
    %c2_31 = arith.constant 2 : index
    %c0_32 = arith.constant 0 : index
    %c0_33 = arith.constant 0 : index
    %34 = vector.load %arg6[%c0_30, %c2_31, %c0_32, %c0_33] : memref<1x4x8x8xbf16, #tpu.memory_space<vmem>>, vector<1x1x8x8xbf16>
    %35 = vector.shape_cast %34 : vector<1x1x8x8xbf16> to vector<8x8xbf16>
    %36 = vector.shape_cast %33 : vector<8x8xbf16> to vector<1x1x8x8xbf16>
    tpu.vector_store %arg6[%c0_30, %c2_31, %c0_32, %c0_33], %36 {strides = array<i32>} : memref<1x4x8x8xbf16, #tpu.memory_space<vmem>>, vector<1x1x8x8xbf16>,
    %37 = vector.extract_strided_slice %4 {offsets = [0, 80], sizes = [8, 8], strides = [1, 1]} : vector<8x96xbf16> to vector<8x8xbf16>
    %c0_34 = arith.constant 0 : index
    %c2_35 = arith.constant 2 : index
    %c0_36 = arith.constant 0 : index
    %c0_37 = arith.constant 0 : index
    %38 = vector.load %arg7[%c0_34, %c2_35, %c0_36, %c0_37] : memref<1x4x8x8xbf16, #tpu.memory_space<vmem>>, vector<1x1x8x8xbf16>
    %39 = vector.shape_cast %38 : vector<1x1x8x8xbf16> to vector<8x8xbf16>
    %40 = vector.shape_cast %37 : vector<8x8xbf16> to vector<1x1x8x8xbf16>
    tpu.vector_store %arg7[%c0_34, %c2_35, %c0_36, %c0_37], %40 {strides = array<i32>} : memref<1x4x8x8xbf16, #tpu.memory_space<vmem>>, vector<1x1x8x8xbf16>,
    %41 = vector.extract_strided_slice %4 {offsets = [0, 24], sizes = [8, 8], strides = [1, 1]} : vector<8x96xbf16> to vector<8x8xbf16>
    %c0_38 = arith.constant 0 : index
    %c3 = arith.constant 3 : index
    %c0_39 = arith.constant 0 : index
    %c0_40 = arith.constant 0 : index
    %42 = vector.load %arg5[%c0_38, %c3, %c0_39, %c0_40] : memref<1x4x8x8xbf16, #tpu.memory_space<vmem>>, vector<1x1x8x8xbf16>
    %43 = vector.shape_cast %42 : vector<1x1x8x8xbf16> to vector<8x8xbf16>
    %44 = vector.shape_cast %41 : vector<8x8xbf16> to vector<1x1x8x8xbf16>
    tpu.vector_store %arg5[%c0_38, %c3, %c0_39, %c0_40], %44 {strides = array<i32>} : memref<1x4x8x8xbf16, #tpu.memory_space<vmem>>, vector<1x1x8x8xbf16>,
    %45 = vector.extract_strided_slice %4 {offsets = [0, 56], sizes = [8, 8], strides = [1, 1]} : vector<8x96xbf16> to vector<8x8xbf16>
    %c0_41 = arith.constant 0 : index
    %c3_42 = arith.constant 3 : index
    %c0_43 = arith.constant 0 : index
    %c0_44 = arith.constant 0 : index
    %46 = vector.load %arg6[%c0_41, %c3_42, %c0_43, %c0_44] : memref<1x4x8x8xbf16, #tpu.memory_space<vmem>>, vector<1x1x8x8xbf16>
    %47 = vector.shape_cast %46 : vector<1x1x8x8xbf16> to vector<8x8xbf16>
    %48 = vector.shape_cast %45 : vector<8x8xbf16> to vector<1x1x8x8xbf16>
    tpu.vector_store %arg6[%c0_41, %c3_42, %c0_43, %c0_44], %48 {strides = array<i32>} : memref<1x4x8x8xbf16, #tpu.memory_space<vmem>>, vector<1x1x8x8xbf16>,
    %49 = vector.extract_strided_slice %4 {offsets = [0, 88], sizes = [8, 8], strides = [1, 1]} : vector<8x96xbf16> to vector<8x8xbf16>
    %c0_45 = arith.constant 0 : index
    %c3_46 = arith.constant 3 : index
    %c0_47 = arith.constant 0 : index
    %c0_48 = arith.constant 0 : index
    %50 = vector.load %arg7[%c0_45, %c3_46, %c0_47, %c0_48] : memref<1x4x8x8xbf16, #tpu.memory_space<vmem>>, vector<1x1x8x8xbf16>
    %51 = vector.shape_cast %50 : vector<1x1x8x8xbf16> to vector<8x8xbf16>
    %52 = vector.shape_cast %49 : vector<8x8xbf16> to vector<1x1x8x8xbf16>
    tpu.vector_store %arg7[%c0_45, %c3_46, %c0_47, %c0_48], %52 {strides = array<i32>} : memref<1x4x8x8xbf16, #tpu.memory_space<vmem>>, vector<1x1x8x8xbf16>,
    return
  }
  func.func @transform_0(%arg0: i32, %arg1: i32) -> (i32, i32, i32) {
    %c0_i32 = arith.constant 0 : i32
    %c0_i32_0 = arith.constant 0 : i32
    return %arg0, %arg1, %c0_i32 : i32, i32, i32
  }
  func.func @transform_1(%arg0: i32, %arg1: i32) -> (i32, i32) {
    %c0_i32 = arith.constant 0 : i32
    %c0_i32_0 = arith.constant 0 : i32
    %c0_i32_1 = arith.constant 0 : i32
    return %c0_i32, %c0_i32_0 : i32, i32
  }
  func.func @transform_2(%arg0: i32, %arg1: i32) -> (i32, i32) {
    %c0_i32 = arith.constant 0 : i32
    %c0_i32_0 = arith.constant 0 : i32
    %c0_i32_1 = arith.constant 0 : i32
    return %c0_i32, %c0_i32_0 : i32, i32
  }
  func.func @transform_3(%arg0: i32, %arg1: i32) -> (i32, i32, i32, i32) {
    %c0_i32 = arith.constant 0 : i32
    %c0_i32_0 = arith.constant 0 : i32
    %c0_i32_1 = arith.constant 0 : i32
    return %arg0, %c0_i32, %arg1, %c0_i32_0 : i32, i32, i32, i32
  }
  func.func @transform_4(%arg0: i32, %arg1: i32) -> (i32, i32, i32, i32) {
    %c0_i32 = arith.constant 0 : i32
    %c0_i32_0 = arith.constant 0 : i32
    %c0_i32_1 = arith.constant 0 : i32
    return %arg0, %c0_i32, %arg1, %c0_i32_0 : i32, i32, i32, i32
  }
  func.func @transform_5(%arg0: i32, %arg1: i32) -> (i32, i32, i32, i32) {
    %c0_i32 = arith.constant 0 : i32
    %c0_i32_0 = arith.constant 0 : i32
    %c0_i32_1 = arith.constant 0 : i32
    return %arg0, %c0_i32, %arg1, %c0_i32_0 : i32, i32, i32, i32
  }
}

</mosaic_0001>

<bundles_post_ra>
// kernel: tpu_custom_call.1
= control target key start
LH: loop header
LB: loop body
LE: loop exit
PB: predicated region body
PF: predicated region fallthrough
CT: control target
= control target key end

     0   :  { %11 = vsyncpa [#allocation3], 0  ;;  %s1369_s0 = inlined_call_operand.hbm [shape: bf16[2,8,32], index: 0, kind: input, shape index: {}]   ;;  %s1370_s1 = inlined_call_operand.hbm [shape: bf16[32,96], index: 1, kind: input, shape index: {}]   ;;  %s1371_s2 = inlined_call_operand.vmem [shape: f32[1,96], index: 2, kind: input, shape index: {}]   ;;  %s1372_s3 = inlined_call_operand.hbm [shape: bf16[2,4,8,8], index: 3, kind: output, shape index: {0}]   ;;  %s1373_s4 = inlined_call_operand.hbm [shape: bf16[2,4,8,8], index: 4, kind: output, shape index: {1}]   ;;  %s1374_s5 = inlined_call_operand.hbm [shape: bf16[2,4,8,8], index: 5, kind: output, shape index: {2}]  }
   0x1   :  { %13 = vsyncpa [#allocation3 + $0x1], 0 }
   0x2   :  { %14 = vsyncpa [#allocation6], 0 }
   0x3   :  { %15 = vsyncpa [#allocation4], 0 }
   0x4   :  { %17 = vsyncpa [#allocation4 + $0x1], 0 }
   0x5   :  { %18 = vsyncpa [#allocation9], 0 }
   0x6   :  { %20 = vsyncpa [#allocation9 + $0x1], 0  ;;  %s1043_s18 = smov 0   ;;  %s1045_s19 = smov 0  }
   0x7   :  { %s1047_s2 = smov 0   ;;  %s1049_s20 = smov 0  }
   0x8   :  { %s1051_s21 = smov 0   ;;  %s1053_s22 = smov 0  }
   0x9 LB: > { %s1074_s23 = sadd.s32 4294967295, %s990_s22   ;;  %s1378_s24 = sadd.s32 4294967294, %s990_s22   ;;  %s990_s22 = sphi %s1053_s22, %s26_s22   ;;  %s986_s21 = sphi %s1051_s21, %s1399_s21   ;;  %s982_s20 = sphi %s1049_s20, %s1398_s20   ;;  %s978_s2 = sphi %s1047_s2, %s1397_s2   ;;  %s974_s19 = sphi %s1045_s19, %s1396_s19   ;;  %s970_s18 = sphi %s1043_s18, %s1395_s18  }
   0xa   : > { %p60_p0 = scmp.ne.s32.totalorder %s974_s19, %s970_s18  ;;  %p1375_p1 = scmp.eq.s32.totalorder %s1074_s23, 0 }
   0xb   : > { %p134_p3 = scmp.eq.s32.totalorder %s1378_s24, 1  ;;  %p635_p5 = scmp.ge.s32.totalorder %s990_s22, 1 }
   0xc   : > { %p1085_p4 = por %p1375_p1, %p60_p0  ;;  %p197_p7 = scmp.lt.s32.totalorder %s990_s22, 3 }
   0xd   : > { %p1090_p6 = por %p134_p3, %p60_p0  ;;  %s992_s28 = smov [#allocation5]  }
   0xe   : > { %s1379_s25 = scalar_select %p1085_p4, 1, 0 }
   0xf   : > { %s1380_s26 = scalar_select %p1090_p6, 1, 0 }
  0x10   : > { %p1095_p8 = pnand %p635_p5, %p197_p7  ;;  %s209_s29 = sshll.u32 %s992_s28, 4  ;;  %s210_s29 = int_to_ptr.vmem [resolvable:$true] %s209_s29 }
  0x11   : > { %s38_s6 = sadd.s32 1, %s986_s21  ;;  %s786_s9 = scalar_lea.hbm %s1370_s1, 256 }
  0x12   : > { %s1381_s27 = scalar_select %p1095_p8, 1, 0 }
  0x13   : > { %p697_p9 = pneg %p1095_p8  ;;  %p787_p12 = scmp.ne.s32.totalorder %s1370_s1, %s786_s9 }
  0x14   : > { %p793_p5 = scmp.lt.u32.totalorder %s786_s9, %s1370_s1 }
  0x15   : > { %p1104_p11 = pnand %p697_p9, %p1375_p1 }
  0x17   : > { %p788_p13 = pneg %p1104_p11 }
  0x19   : > { %p789_p0 = pnand %p788_p13, %p787_p12 }
  0x1b   : > { %p790_p3 = pneg %p789_p0 }
  0x1d   : > { %p795_p7 = pnand %p793_p5, %p790_p3 }
  0x1f   : > { %798 = shalt.err (!%p795_p7)
}
  0x20   : > { %s799_s14 = scalar_lea.vmem %s210_s29, 256  ;;  %p807_p2 = scmp.lt.s32.totalorder %s210_s29, %s210_s29 }
  0x21   : > { %p800_p9 = scmp.ne.s32.totalorder %s210_s29, %s799_s14  ;;  %p808_p6 = scmp.lt.s32.totalorder %s799_s14, %s799_s14 }
  0x23   : > { %p802_p10 = pnand %p800_p9, %p788_p13  ;;  %p809_p4 = por %p808_p6, %p807_p2 }
  0x25   : > { %p803_p1 = pneg %p802_p10 }
  0x27   : > { %p810_p8 = pnand %p809_p4, %p803_p1 }
  0x29   : > { %813 = shalt.err (!%p810_p8)
}
  0x2a   : > { %s993_s15 = smov 64   ;;  %s994_s16 = smov 4  }
  0x2b   : > { %700 = dma.hbm_to_vmem [thread:$0]  (!%p1104_p11), %s1370_s1, 256, %s210_s29, [#allocation6], %s993_s15, %s993_s15, %s994_s16  }
  0x2c   : > { %p40_p1 = scmp.ge.s32.totalorder %s38_s6, 2  ;;  %s47_s7 = sadd.s32 1, %s978_s2 }
  0x2d   : > { %p54_p2 = scmp.ne.s32.totalorder %s978_s2, %s974_s19  ;;  %p55_p4 = scmp.eq.s32.totalorder %s990_s22, 0 }
  0x2e   : > { %s1401_s6 = smov (%p40_p1, %s38_s6), 0  ;;  %p1384_p8 = scmp.eq.s32.totalorder %s1074_s23, 1 }
  0x2f   : > { %p1131_p6 = por %p55_p4, %p54_p2  ;;  %s42_s30 = ssub.s32 %s986_s21, %s1401_s6 }
  0x30   : > { %p1137_p10 = por %p1384_p8, %p54_p2  ;;  %p716_p12 = scmp.lt.s32.totalorder %s990_s22, 2 }
  0x31   : > { %p45_p11 = scmp.eq.s32.totalorder %s42_s30, 0  ;;  %s226_s29 = sand.u32 1, %s978_s2  }
  0x32   : > { %s638_s10 = sshll.u32 %s226_s29, 2  ;;  %s639_s12 = sshll.u32 %s986_s21, 6 }
  0x33   : > { %s1146_s11 = scalar_select %p45_p11, %s978_s2, %s47_s7  }
  0x34   : > { %s1152_s15 = scalar_lea.hbm %s1369_s0, %s639_s12  ;;  %s230_s16 = scalar_lea.vmem [#allocation2], %s638_s10 }
  0x35   : > { %s238_s17 = sshll.u32 %s230_s16, 4  ;;  %p1158_p13 = pnand %p716_p12, %p1131_p6  ;;  %s1154_s17 = int_to_ptr.vmem [resolvable:$true] %s238_s17 }
  0x36   : > { %s227_s7 = scalar_lea.sflag [#allocation3], %s226_s29  ;;  %s814_s30 = scalar_lea.hbm %s1152_s15, 64 }
  0x37   : > { %p815_p0 = scmp.ne.s32.totalorder %s1152_s15, %s814_s30  ;;  %p816_p3 = pneg %p1158_p13 }
  0x38   : > { %s819_s13 = scalar_lea.hbm %s1369_s0, 128  ;;  %p820_p9 = scmp.lt.u32.totalorder %s1152_s15, %s1369_s0 }
  0x39   : > { %p817_p5 = pnand %p816_p3, %p815_p0  ;;  %p821_p1 = scmp.lt.u32.totalorder %s819_s13, %s814_s30 }
  0x3a   : > { %p823_p4 = scmp.lt.u32.totalorder %s814_s30, %s1152_s15 }
  0x3b   : > { %p818_p7 = pneg %p817_p5  ;;  %p822_p2 = por %p821_p1, %p820_p9 }
  0x3d   : > { %p824_p6 = por %p823_p4, %p822_p2 }
  0x3f   : > { %p825_p8 = pnand %p824_p6, %p818_p7 }
  0x41   : > { %828 = shalt.err (!%p825_p8)
}
  0x42   : > { %s829_s29 = scalar_lea.vmem %s1154_s17, 64  ;;  %s995_s16 = smov [#allocation2]  }
  0x43   : > { %p830_p12 = scmp.ne.s32.totalorder %s1154_s17, %s829_s29  ;;  %s834_s10 = sshll.u32 %s995_s16, 4  ;;  %s835_s10 = int_to_ptr.vmem [resolvable:$false] %s834_s10 }
  0x44   : > { %s836_s12 = scalar_lea.vmem %s835_s10, 128  ;;  %p837_p5 = scmp.lt.s32.totalorder %s1154_s17, %s835_s10 }
  0x45   : > { %p832_p11 = pnand %p830_p12, %p816_p3  ;;  %p838_p9 = scmp.lt.s32.totalorder %s836_s12, %s829_s29 }
  0x47   : > { %p833_p0 = pneg %p832_p11  ;;  %p839_p1 = por %p838_p9, %p837_p5 }
  0x49   : > { %p840_p2 = pnand %p839_p1, %p833_p0 }
  0x4b   : > { %843 = shalt.err (!%p840_p2)
}
  0x4c   : > { %704 = dma.hbm_to_vmem [thread:$0]  (!%p1158_p13), %s1152_s15, 64, %s1154_s17, %s227_s7  }
  0x4d   : > { %p1387_p7 = scmp.ne.s32.totalorder %s1381_s27, 0 }
  0x4e   : > { %s1190_s30 = sand.u32 (!%p1387_p7), 1, %s974_s19   ;;  %p1388_p3 = scmp.ne.s32.totalorder (!%p1387_p7), %s1379_s25, 0 }
  0x4f   : > { %247 = sbr.rel (%p1387_p7) target bundleno = 494 (0x1ee), region = 32  ;;  %s641_s13 = sshll.u32 (!%p1387_p7), %s1190_s30, 2 }
  0x50   : > { %s250_s8 = scalar_lea.sflag (!%p1387_p7), [#allocation3], %s1190_s30  ;;  %s253_s14 = scalar_lea.vmem (!%p1387_p7), [#allocation2], %s641_s13 }
  0x56   : > { %953 = dma.done.wait (%p1388_p3), %s250_s8, 64  }
  0x57   : > { %955 = vsyncadd (%p1388_p3), %s250_s8, 4294967232  ;;  %p1389_p4 = scmp.eq.s32.totalorder %s1074_s23, 0 }
  0x59   : > { %957 = dma.done.wait (%p1389_p4), [#allocation6], 256   ;;  %p1390_p13 = pmov %p1389_p4 }
  0x5a   : > { %v996_v0 = vmov 0.0   ;;  %vm997_vm0 = vmmov 0   ;;  %v784_v1 = vld [vmem:[#allocation5] sm:$0xff]   ;;  %v785_v2 = vld [vmem:[#allocation5 + $0x8] sm:$0xff]   ;;  %v295_v3 = vld [vmem:[%s253_s14] sm:$0xf] }
  0x5b   : > { %959 = vsyncadd (%p1390_p13), [#allocation6], 4294967040  ;;  %677 = vmatprep.subr.bf16.mxu0 %v996_v0  ;;  %681 = vmatprep.mubr.msk.bf16.mxu0 %vm997_vm0, %v996_v0  ;;  %vm312_vm1 = vcmask 261120   ;;  %s1203_s25 = sshll.u32 %s1190_s30, 4  ;;  %vm357_vm2 = vcmask 60416   ;;  %s998_s27 = smov 80  }
  0x5c   : > { %678 = vmatpush3.bf16.msra.mxu0 %v784_v1  ;;  %s999_s15 = smov 96   ;;  %s1206_s17 = scalar_lea.vmem [#allocation7], %s1203_s25 }
  0x5d   : > { %679 = vmatprep.subr.bf16.mxu0 %v996_v0  ;;  %s1000_s28 = smov 72   ;;  %s1001_s7 = smov 88  }
  0x5e   : > { %s1002_s29 = smov 120   ;;  %s1003_s16 = smov 64  }
  0x5f   : > { %s1004_s10 = smov 112   ;;  %s1005_s12 = smov 56  }
  0x60   : > { %680 = vmatpush3.bf16.msra.mxu0 %v785_v2  ;;  %s1006_s13 = smov 104   ;;  %s1007_s8 = smov 48  }
  0x61   : > { %s1008_s14 = smov 40  }
  0x63   : > { %682 = vmatmul.mubr.msk.bf16.vlgmr.msra.gmra.mrb[0].mxu0 %vm312_vm1, %v295_v3 }
 0x136   : > { %v350_v4 = vpop.f32.mrb[0].mxu0 }
 0x137   : > { %v356_v5 = vpack.c.bf16 %v350_v4, %v350_v4  ;;  %v683_v6 = vpop.f32.mrb[1].mxu0 }
 0x138   : > { %v353_v7 = vpop.f32.mrb[2].mxu0 }
 0x139   : > { %390 = vrot.lane.b32.xlu1 %v356_v5, %s998_s27  ;;  %362 = vrot.lane.b32.xlu0 %v356_v5, %s999_s15  ;;  %v684_v8 = vpop.f32.mrb[3].mxu0  ;;  %358 = vst.msk [vmem:[%s1206_s17] sm:$0xf] %vm357_vm2, %v356_v5  ;;  %s286_s27 = scalar_lea.vmem [#allocation8], %s1203_s25 }
 0x13a   : > { %s457_s15 = sshll.u32 %s286_s27, 4  ;;  %s1218_s15 = int_to_ptr.vmem [resolvable:$true] %s457_s15 }
 0x13d   : > { %405 = vrot.lane.b32.xlu1 %v356_v5, %s1000_s28  ;;  %375 = vrot.lane.b32.xlu0 %v356_v5, %s1001_s7  ;;  %s420_s28 = sand.u32 1, %s1074_s23   ;;  %s1214_s7 = sshll.u32 %s982_s20, 8 }
 0x13e   : > { %s1228_s20 = scalar_lea.sflag [#allocation9], %s420_s28  ;;  %s844_s23 = scalar_lea.vmem %s1218_s15, 256 }
 0x13f   : > { %p845_p6 = scmp.ne.s32.totalorder %s1218_s15, %s844_s23 }
 0x141   : > { %370 = vrot.lane.b32.xlu1 %v356_v5, %s1002_s29  ;;  %366 = vrot.lane.b32.xlu0 %v356_v5, %s1003_s16  ;;  %p846_p8 = pnand %p845_p6, %p1137_p10 }
 0x143   : > { %p847_p12 = pneg %p846_p8 }
 0x145   : > { %385 = vrot.lane.b32.xlu1 %v356_v5, %s1004_s10  ;;  %380 = vrot.lane.b32.xlu0 %v356_v5, %s1005_s12  ;;  %s1224_s12 = scalar_lea.hbm %s1373_s4, %s1214_s7 }
 0x149   : > { %400 = vrot.lane.b32.xlu1 %v356_v5, %s1006_s13  ;;  %395 = vrot.lane.b32.xlu0 %v356_v5, %s1007_s8  ;;  %s1009_s13 = smov [#allocation8]  }
 0x14a   : > { %s848_s8 = sshll.u32 %s1009_s13, 4  ;;  %s849_s8 = int_to_ptr.vmem [resolvable:$false] %s848_s8 }
 0x14b   : > { %p851_p11 = scmp.lt.s32.totalorder %s1218_s15, %s849_s8 }
 0x14d   : > { %410 = vrot.lane.b32.xlu0 %v356_v5, %s1008_s14  ;;  %s850_s14 = scalar_lea.vmem %s849_s8, 512 }
 0x14e   : > { %p852_p0 = scmp.lt.s32.totalorder %s850_s14, %s844_s23 }
 0x150   : > { %p853_p5 = por %p852_p0, %p851_p11 }
 0x152   : > { %p854_p9 = pnand %p853_p5, %p847_p12 }
 0x1ab   : > { %v391_v9 = vpop.permute.xlu1 %390  ;;  %v363_v10 = vpop.permute.xlu0 %362 }
 0x1ac   : > { %654 = vst.msk [vmem:[%s286_s27 + $0x8] sm:$0xf] %vm357_vm2, %v391_v9  ;;  %365 = vst.msk [vmem:[%s286_s27] sm:$0xf] %vm357_vm2, %v363_v10 }
 0x1af   : > { %v406_v11 = vpop.permute.xlu1 %405  ;;  %v376_v12 = vpop.permute.xlu0 %375 }
 0x1b0   : > { %657 = vst.msk [vmem:[%s286_s27 + $0xc] sm:$0xf] %vm357_vm2, %v406_v11  ;;  %651 = vst.msk [vmem:[%s286_s27 + $0x4] sm:$0xf] %vm357_vm2, %v376_v12 }
 0x1b1   : > { %857 = shalt.err (!%p854_p9)
}
 0x1b2   : > { %s858_s27 = scalar_lea.hbm %s1224_s12, 256  ;;  %s862_s10 = scalar_lea.hbm %s1373_s4, 512 }
 0x1b3   : > { %p859_p1 = scmp.ne.s32.totalorder %s1224_s12, %s858_s27  ;;  %p863_p3 = scmp.lt.u32.totalorder %s1224_s12, %s1373_s4 }
 0x1b4   : > { %p864_p4 = scmp.lt.u32.totalorder %s862_s10, %s858_s27  ;;  %p866_p6 = scmp.lt.u32.totalorder %s858_s27, %s1224_s12 }
 0x1b5   : > { %p860_p2 = pnand %p859_p1, %p1137_p10 }
 0x1b6   : > { %p865_p13 = por %p864_p4, %p863_p3 }
 0x1b7   : > { %p861_p7 = pneg %p860_p2 }
 0x1b8   : > { %p867_p8 = por %p866_p6, %p865_p13 }
 0x1ba   : > { %p868_p12 = pnand %p867_p8, %p861_p7 }
 0x1bc   : > { %871 = shalt.err (!%p868_p12)
}
 0x1bd   : > { %s1010_s23 = smov 4   ;;  %v371_v13 = vpop.permute.xlu1 %370  ;;  %v367_v14 = vpop.permute.xlu0 %366  ;;  %s1258_s14 = scalar_lea.vmem [#allocation10], %s1203_s25 }
 0x1be   : > { %692 = dma.vmem_to_hbm [thread:$0]  (%p1137_p10), %s1218_s15, 256, %s1224_s12, %s1228_s20, %s1003_s16, %s1003_s16, %s1010_s23  }
 0x1bf   : > { %650 = vst.msk [vmem:[%s1206_s17 + $0x4] sm:$0xf] %vm357_vm2, %v371_v13  ;;  %369 = vst.msk [vmem:[%s1258_s14] sm:$0xf] %vm357_vm2, %v367_v14  ;;  %s440_s27 = sshll.u32 %s1206_s17, 4  ;;  %s1273_s25 = scalar_lea.hbm %s1372_s3, %s1214_s7  ;;  %s1267_s27 = int_to_ptr.vmem [resolvable:$true] %s440_s27 }
 0x1c0   : > { %s416_s29 = scalar_lea.sflag [#allocation4], %s1190_s30  ;;  %s872_s10 = scalar_lea.vmem %s1267_s27, 256 }
 0x1c1   : > { %v386_v15 = vpop.permute.xlu1 %385  ;;  %v381_v16 = vpop.permute.xlu0 %380  ;;  %p873_p11 = scmp.ne.s32.totalorder %s1267_s27, %s872_s10  ;;  %s1011_s13 = smov [#allocation7]  }
 0x1c2   : > { %653 = vst.msk [vmem:[%s1206_s17 + $0x8] sm:$0xf] %vm357_vm2, %v386_v15  ;;  %652 = vst.msk [vmem:[%s1258_s14 + $0x4] sm:$0xf] %vm357_vm2, %v381_v16  ;;  %s876_s8 = sshll.u32 %s1011_s13, 4  ;;  %s877_s8 = int_to_ptr.vmem [resolvable:$false] %s876_s8 }
 0x1c3   : > { %p874_p0 = pnand %p873_p11, %p1137_p10  ;;  %s878_s15 = scalar_lea.vmem %s877_s8, 512 }
 0x1c4   : > { %p879_p9 = scmp.lt.s32.totalorder %s1267_s27, %s877_s8  ;;  %p880_p1 = scmp.lt.s32.totalorder %s878_s15, %s872_s10 }
 0x1c5   : > { %v401_v17 = vpop.permute.xlu1 %400  ;;  %v396_v18 = vpop.permute.xlu0 %395  ;;  %p875_p5 = pneg %p874_p0 }
 0x1c6   : > { %656 = vst.msk [vmem:[%s1206_s17 + $0xc] sm:$0xf] %vm357_vm2, %v401_v17  ;;  %655 = vst.msk [vmem:[%s1258_s14 + $0x8] sm:$0xf] %vm357_vm2, %v396_v18  ;;  %p881_p2 = por %p880_p1, %p879_p9 }
 0x1c8   : > { %p882_p7 = pnand %p881_p2, %p875_p5 }
 0x1ca   : > { %885 = shalt.err (!%p882_p7)
}
 0x1cb   : > { %s886_s17 = scalar_lea.hbm %s1273_s25, 256  ;;  %s890_s13 = scalar_lea.hbm %s1372_s3, 512 }
 0x1cc   : > { %p887_p3 = scmp.ne.s32.totalorder %s1273_s25, %s886_s17  ;;  %p891_p6 = scmp.lt.u32.totalorder %s1273_s25, %s1372_s3 }
 0x1cd   : > { %p892_p8 = scmp.lt.u32.totalorder %s890_s13, %s886_s17  ;;  %p894_p11 = scmp.lt.u32.totalorder %s886_s17, %s1273_s25 }
 0x1ce   : > { %p888_p4 = pnand %p887_p3, %p1137_p10 }
 0x1cf   : > { %p893_p12 = por %p892_p8, %p891_p6 }
 0x1d0   : > { %p889_p13 = pneg %p888_p4 }
 0x1d1   : > { %p895_p0 = por %p894_p11, %p893_p12 }
 0x1d3   : > { %p896_p5 = pnand %p895_p0, %p889_p13 }
 0x1d5   : > { %899 = shalt.err (!%p896_p5)
}
 0x1d6   : > { %691 = dma.vmem_to_hbm [thread:$0]  (%p1137_p10), %s1267_s27, 256, %s1273_s25, %s416_s29, %s1003_s16, %s1003_s16, %s1010_s23   ;;  %v411_v19 = vpop.permute.xlu0 %410 }
 0x1d7   : > { %s1391_s24 = sshll.u32 %s1258_s14, 4  ;;  %s1315_s15 = scalar_lea.hbm %s1374_s5, %s1214_s7  ;;  %658 = vst.msk [vmem:[%s1258_s14 + $0xc] sm:$0xf] %vm357_vm2, %v411_v19  ;;  %s1309_s24 = int_to_ptr.vmem [resolvable:$true] %s1391_s24 }
 0x1d8   : > { %s900_s30 = scalar_lea.vmem %s1309_s24, 256  ;;  %s1012_s27 = smov [#allocation10]  }
 0x1d9   : > { %p901_p9 = scmp.ne.s32.totalorder %s1309_s24, %s900_s30  ;;  %s904_s25 = sshll.u32 %s1012_s27, 4  ;;  %s905_s25 = int_to_ptr.vmem [resolvable:$false] %s904_s25 }
 0x1da   : > { %s906_s29 = scalar_lea.vmem %s905_s25, 512  ;;  %p907_p7 = scmp.lt.s32.totalorder %s1309_s24, %s905_s25 }
 0x1db   : > { %p902_p1 = pnand %p901_p9, %p1137_p10  ;;  %p908_p3 = scmp.lt.s32.totalorder %s906_s29, %s900_s30 }
 0x1dd   : > { %p903_p2 = pneg %p902_p1  ;;  %p909_p4 = por %p908_p3, %p907_p7 }
 0x1df   : > { %p910_p13 = pnand %p909_p4, %p903_p2 }
 0x1e1   : > { %913 = shalt.err (!%p910_p13)
}
 0x1e2   : > { %s914_s7 = scalar_lea.hbm %s1315_s15, 256  ;;  %s918_s12 = scalar_lea.hbm %s1374_s5, 512 }
 0x1e3   : > { %p915_p6 = scmp.ne.s32.totalorder %s1315_s15, %s914_s7  ;;  %p919_p11 = scmp.lt.u32.totalorder %s1315_s15, %s1374_s5 }
 0x1e4   : > { %p920_p0 = scmp.lt.u32.totalorder %s918_s12, %s914_s7  ;;  %p922_p9 = scmp.lt.u32.totalorder %s914_s7, %s1315_s15 }
 0x1e5   : > { %p916_p8 = pnand %p915_p6, %p1137_p10 }
 0x1e6   : > { %p921_p5 = por %p920_p0, %p919_p11 }
 0x1e7   : > { %p917_p12 = pneg %p916_p8 }
 0x1e8   : > { %p923_p1 = por %p922_p9, %p921_p5 }
 0x1ea   : > { %p924_p2 = pnand %p923_p1, %p917_p12 }
 0x1ec   : > { %927 = shalt.err (!%p924_p2)
}
 0x1ed   : > { %693 = dma.vmem_to_hbm [thread:$0]  (%p1137_p10), %s1309_s24, 256, %s1315_s15, %s1228_s20, %s1003_s16, %s1003_s16, %s1010_s23  }
 0x1ee PF: > { %s489_s28 = sand.u32 1, %s970_s18   ;;  %p1392_p7 = scmp.ne.s32.totalorder %s1380_s26, 0 }
 0x1ef   : > { %p1393_p3 = scmp.ge.s32.totalorder %s990_s22, 2  ;;  %s490_s10 = scalar_lea.sflag [#allocation4], %s489_s28 }
 0x1f1   : > { %p706_p4 = pnand %p1393_p3, %p1392_p7 }
 0x1f3   : > { %961 = dma.done.wait (!%p706_p4), %s490_s10, 256  }
 0x1f4   : > { %963 = vsyncadd (!%p706_p4), %s490_s10, 4294967040  ;;  %s1394_s9 = sadd.s32 4294967294, %s990_s22  }
 0x1f5   : > { %s498_s30 = sand.u32 1, %s1394_s9  }
 0x1f6   : > { %s499_s27 = scalar_lea.sflag [#allocation9], %s498_s30 }
 0x1f7   : > { %965 = dma.done.wait (!%p706_p4), %s499_s27, 512  }
 0x1f8   : > { %967 = vsyncadd (!%p706_p4), %s499_s27, 4294966784  ;;  %s26_s22 = sadd.s32 1, %s990_s22   ;;  %s1395_s18 = smov %s974_s19 }
 0x1f9   : > { %p23_p10 = scmp.ge.s32.totalorder %s26_s22, 4   ;;  %s1396_s19 = smov %s978_s2 }
 0x1fa   : > { %s1397_s2 = smov %s1146_s11  ;;  %s1398_s20 = smov %s986_s21 }
 0x1fb   : > { %s1399_s21 = smov %s1401_s6  ;;  %25 = sbr.rel (!%p23_p10) target bundleno = 9 (0x9), region = 122 }
 0x202   :  { %513 = vsyncpa [#allocation3], 1 }
 0x203   :  { %515 = vsyncpa [#allocation3 + $0x1], 1 }
 0x204   :  { %516 = vsyncpa [#allocation6], 1 }
 0x205   :  { %517 = vsyncpa [#allocation4], 1 }
 0x206   :  { %519 = vsyncpa [#allocation4 + $0x1], 1 }
 0x207   :  { %520 = vsyncpa [#allocation9], 1 }
 0x208   :  { %522 = vsyncpa [#allocation9 + $0x1], 1 }

</bundles_post_ra>
